<compile_context>
chip_gen: v7x
topology: tpu7x:2x2x1
jax: 0.10.0
libtpu: 0.0.40
codegen_flags: <defaults>
</compile_context>

<pallas_src>
import math

import jax
import jax.numpy as jnp
from jax.experimental import pallas as pl
from jax.experimental.pallas import tpu as pltpu


# ---------------------------------------------------------------------------
# helpers
# ---------------------------------------------------------------------------

def _round_up(x: int, m: int) -> int:
    return (x + m - 1) // m * m


def _vmem_budget_and_limit():
    """(tile budget bytes, vmem_limit_bytes) sized per TPU generation."""
    try:
        cap = pltpu.get_tpu_info().vmem_capacity_bytes
    except Exception:
        cap = 64 * 1024 * 1024                      # conservative fallback (v7x-sized)
    limit = min(max(cap // 2, 32 * 1024 * 1024), 64 * 1024 * 1024)
    budget = limit - 8 * 1024 * 1024                # headroom for Mosaic internal scratch
    return budget, limit


def _largest_div(m: int, limit: int) -> int:
    """Largest divisor of m that is <= limit (>=1)."""
    for d in range(min(m, max(limit, 1)), 0, -1):
        if m % d == 0:
            return d
    return 1


def _choose_tile_post(lp: int, h: int, itemsize: int, w_bytes: int,
                      budget: int, n_batch: int) -> int:
    """Lane tile for the fused post-SSM kernel.  lp is a multiple of 128.

    Per output lane we pay: double-buffered y/u/out streams, ~2 (H,TL) f32 GELU/z
    temporaries and the (2H,TL) f32 matmul accumulator.  The double-buffered W (and the
    tiny D/b/mult blocks) are charged as residents.
    """
    per_lane = 2 * h * (3 * itemsize) + 2 * h * 4 + 2 * h * 4
    avail = max(budget - 2 * w_bytes, 128 * per_lane)
    cap_lanes = min(max(avail // per_lane, 128), 2048)
    m = lp // 128
    d = _largest_div(m, cap_lanes // 128)
    if n_batch * (m // d) < 2 and m > 1:            # v7x megacore: feed both TensorCores
        d = _largest_div(m, m // 2)
    return 128 * d


def _choose_tile_elemwise(lp: int, rows: int, itemsize: int,
                          budget: int, n_batch: int) -> int:
    per_lane = 2 * 2 * rows * itemsize              # double-buffered x + out streams
    cap_lanes = min(max(budget // per_lane, 128), 4096)
    m = lp // 128
    d = _largest_div(m, cap_lanes // 128)
    if n_batch * (m // d) < 2 and m > 1:
        d = _largest_div(m, m // 2)
    return 128 * d


def _tied_dropout_multiplier(key, b, d, p, dtype):
    # DropoutNd(tie=True, transposed=True): one Bernoulli(1-p) draw per (batch, channel),
    # broadcast over the length dims.  Inverted-dropout 1/(1-p) scale folded in so the
    # kernel does a single fused multiply.
    # TODO(synk): an in-kernel pltpu.prng_random_bits draw would avoid this tiny O(B*D)
    # wrapper op, but that primitive has no interpret/CPU lowering.
    keep = jax.random.uniform(key, (b, d, 1)) < (1.0 - p)
    return keep.astype(dtype) * (1.0 / (1.0 - p))


# ---------------------------------------------------------------------------
# exact GELU inside the kernel (erf via Abramowitz & Stegun 7.1.26, |err| < 1.5e-7,
# with the divide moved to the EUP via pl.reciprocal(approx=True))
# ---------------------------------------------------------------------------

def _erf(x):
    p = 0.3275911
    a1, a2, a3, a4, a5 = (0.254829592, -0.284496736, 1.421413741,
                          -1.453152027, 1.061405429)
    ax = jnp.abs(x)
    t = pl.reciprocal(1.0 + p * ax, approx=True)    # EUP vrcp instead of a VALU divide
    poly = ((((a5 * t + a4) * t + a3) * t + a2) * t + a1) * t
    e = 1.0 - poly * jnp.exp(-ax * ax)
    return jnp.where(x >= 0, e, -e)


def _gelu(x):
    # matches torch.nn.GELU() (exact / erf form)
    return 0.5 * x * (1.0 + _erf(x * 0.7071067811865476))


# ---------------------------------------------------------------------------
# fused post-SSM kernel:  GLU( Conv1x1( dropout( GELU( y + u*D ) ) ) )
# ---------------------------------------------------------------------------

def _post_math(z, w, b, h, mult=None):
    z = _gelu(z)
    if mult is not None:
        z = z * mult                                 # tied dropout, scale pre-folded
    # MXU matmul in W's (bf16) dtype with f32 accumulation.
    acc = jnp.dot(w, z.astype(w.dtype), preferred_element_type=jnp.float32) + b
    gate = acc[h:, :]
    sig = 0.5 * (jnp.tanh(0.5 * gate) + 1.0)         # sigmoid via EUP tanh
    return acc[:h, :] * sig                          # GLU(dim=-2)


def _s4d_post_kernel_drop(y_ref, u_ref, d_ref, mult_ref, w_ref, b_ref, o_ref):
    """One (H, TL) tile.  y,u: (H,TL); D,mult: (H,1); W: (2H,H); b: (2H,1)."""
    h = o_ref.shape[0]
    z = y_ref[...] + u_ref[...] * d_ref[...]
    o_ref[...] = _post_math(z, w_ref[...], b_ref[...], h, mult_ref[...]).astype(o_ref.dtype)


def _s4d_post_kernel(y_ref, u_ref, d_ref, w_ref, b_ref, o_ref):
    """Dropout-off variant: no mult input, no multiply."""
    h = o_ref.shape[0]
    z = y_ref[...] + u_ref[...] * d_ref[...]
    o_ref[...] = _post_math(z, w_ref[...], b_ref[...], h).astype(o_ref.dtype)


def _s4d_post_pallas(y, u, d, mult, w, b):
    B, H, L = y.shape
    dt = y.dtype
    lp = _round_up(L, 128)                           # pad ONLY to the next 128 multiple
    if lp != L:
        pad = ((0, 0), (0, 0), (0, lp - L))
        y = jnp.pad(y, pad)
        u = jnp.pad(u, pad)

    # MXU is bf16-native on v5e/v6e/v7x: cast the conv1x1 weight (and z inside the
    # kernel) to bf16 for f32 inputs; f32 accumulate + f32 bias/GLU epilogue kept.
    w_dt = jnp.bfloat16 if dt == jnp.dtype(jnp.float32) else dt
    w2 = jnp.asarray(w, w_dt).reshape(2 * H, H)
    d2 = jnp.asarray(d, dt).reshape(H, 1)
    b2 = jnp.asarray(b, jnp.float32).reshape(2 * H, 1)

    budget, limit = _vmem_budget_and_limit()
    tl = _choose_tile_post(lp, H, dt.itemsize, w2.size * w2.dtype.itemsize, budget, B)
    grid = (B, lp // tl)                             # tl divides lp -> unmasked vst stores

    cparams = pltpu.CompilerParams(
        dimension_semantics=("parallel", "parallel"),
        vmem_limit_bytes=limit,
    )

    stream_spec = pl.BlockSpec((None, H, tl), lambda bi, li: (bi, 0, li))
    common = [stream_spec,                                          # y
              pl.BlockSpec((None, H, tl), lambda bi, li: (bi, 0, li)),  # u
              pl.BlockSpec((H, 1), lambda bi, li: (0, 0))]          # D
    tail = [pl.BlockSpec((2 * H, H), lambda bi, li: (0, 0)),        # conv1x1 weight
            pl.BlockSpec((2 * H, 1), lambda bi, li: (0, 0))]        # conv1x1 bias

    if mult is not None:
        m2 = jnp.asarray(mult, dt).reshape(B, H, 1)
        in_specs = common + [pl.BlockSpec((None, H, 1), lambda bi, li: (bi, 0, 0))] + tail
        kernel, args = _s4d_post_kernel_drop, (y, u, d2, m2, w2, b2)
    else:
        in_specs = common + tail
        kernel, args = _s4d_post_kernel, (y, u, d2, w2, b2)

    out = pl.pallas_call(
        kernel,
        out_shape=jax.ShapeDtypeStruct((B, H, lp), dt),
        grid=grid,
        in_specs=in_specs,
        out_specs=pl.BlockSpec((None, H, tl), lambda bi, li: (bi, 0, li)),
        compiler_params=cparams,
    )(*args)
    return out[..., :L] if lp != L else out


def _s4d_post_ref(y, u, d, mult, w, b):
    """Pure-JAX reference for the fused stage (exact erf GELU, f32 matmul)."""
    H = y.shape[1]
    z = jax.nn.gelu(y + u * d[None, :, None], approximate=False)
    if mult is not None:
        z = z * mult
    acc = jnp.einsum("oh,bhl->bol", w.reshape(2 * H, H), z,
                     precision=jax.lax.Precision.HIGHEST) + b[None, :, None]
    return acc[:, :H, :] * jax.nn.sigmoid(acc[:, H:, :])


# ---------------------------------------------------------------------------
# S4DKernel synthesis + FFT convolution (XLA; complex dtype / FFT have no Pallas path)
# ---------------------------------------------------------------------------

def _s4d_kernel_xla(log_dt, c_re, c_im, log_a_real, a_imag, L, chunk=2048):
    dt = jnp.exp(log_dt)                             # (H,)
    c = c_re + 1j * c_im                             # (H, N/2)
    a = -jnp.exp(log_a_real) + 1j * a_imag           # (H, N/2)
    dt_a = a * dt[:, None]                           # (H, N/2)
    c = c * (jnp.exp(dt_a) - 1.0) / a                # (H, N/2)

    def piece(start, n):                             # chunked so the (H, N/2, n)
        ar = jnp.arange(n, dtype=jnp.float32) + start  # complex64 exp never holds all of L
        e = jnp.exp(dt_a[..., None] * ar)
        return 2.0 * jnp.einsum("hn,hnl->hl", c, e).real

    if L <= chunk:
        return piece(0, L).astype(jnp.float32)
    parts = [piece(s, min(chunk, L - s)) for s in range(0, L, chunk)]
    return jnp.concatenate(parts, axis=-1).astype(jnp.float32)


def s4d_forward(u, params, *, dropout_p=0.0, training=True, transposed=True,
                src_key_padding_mask=None, dropout_key=None, use_pallas=True):
    """S4DModule.forward.  u: (B, H, L) if transposed else (B, L, H)."""
    if not transposed:
        u = jnp.swapaxes(u, -1, -2)
    B, H, L = u.shape
    if src_key_padding_mask is not None:
        u = u * (~src_key_padding_mask)[:, None, :].astype(u.dtype)

    k = _s4d_kernel_xla(params["log_dt"], params["C_re"], params["C_im"],
                        params["log_A_real"], params["A_imag"], L)

    # TODO(synk): torch.fft.rfft/irfft has no Pallas equivalent; the length-2L linear
    # convolution stays in XLA (jnp.fft).
    k_f = jnp.fft.rfft(k, n=2 * L)
    u_f = jnp.fft.rfft(u, n=2 * L)
    y = jnp.fft.irfft(u_f * k_f, n=2 * L)[..., :L].astype(u.dtype)

    if training and dropout_p > 0.0:
        if dropout_key is None:
            # NOTE: deterministic fallback -> repeated masks across calls; pass a key.
            dropout_key = jax.random.PRNGKey(0)
        mult = _tied_dropout_multiplier(dropout_key, B, H, dropout_p, u.dtype)
    else:
        mult = None                                  # dropout-off kernel variant

    # GLU row split needs H to be a sublane multiple; fall back to XLA otherwise.
    if use_pallas and H % 8 == 0:
        out = _s4d_post_pallas(y, u, params["D"], mult, params["W_out"], params["b_out"])
    else:
        out = _s4d_post_ref(y, u, params["D"], mult, params["W_out"], params["b_out"])
    if not transposed:
        out = jnp.swapaxes(out, -1, -2)
    return out


# ---------------------------------------------------------------------------
# standalone DropoutNd kernel
# ---------------------------------------------------------------------------

def _dropout_kernel(x_ref, m_ref, o_ref):
    # x: (D, TL), m: (D, 1) tied multiplier with 1/(1-p) scale pre-folded.
    o_ref[...] = (x_ref[...] * m_ref[...]).astype(o_ref.dtype)


def dropout_nd(x, *, p=0.5, tie=True, transposed=True, training=True, key=None):
    """Pallas DropoutNd.forward.  x: (batch, dim, lengths...) when transposed=True."""
    if p < 0 or p >= 1:
        raise ValueError(f"dropout probability has to be in [0, 1), got {p}")
    if not training or p == 0.0:
        return x
    if not tie:
        # TODO(synk): untied (full-shape) mask not implemented; module default is tie=True.
        raise NotImplementedError("only tie=True is implemented")
    if key is None:
        key = jax.random.PRNGKey(0)
    if not transposed:
        x = jnp.moveaxis(x, -1, 1)                   # 'b ... d -> b d ...'

    shape = x.shape
    B, D = shape[0], shape[1]
    L = int(math.prod(shape[2:]))
    x3 = x.reshape(B, D, L)
    mult = _tied_dropout_multiplier(key, B, D, p, x3.dtype)

    lp = _round_up(L, 128)
    if lp != L:
        x3 = jnp.pad(x3, ((0, 0), (0, 0), (0, lp - L)))
    budget, limit = _vmem_budget_and_limit()
    tl = _choose_tile_elemwise(lp, D, x3.dtype.itemsize, budget, B)

    out = pl.pallas_call(
        _dropout_kernel,
        out_shape=jax.ShapeDtypeStruct((B, D, lp), x3.dtype),
        grid=(B, lp // tl),
        in_specs=[pl.BlockSpec((None, D, tl), lambda bi, li: (bi, 0, li)),
                  pl.BlockSpec((None, D, 1), lambda bi, li: (bi, 0, 0))],
        out_specs=pl.BlockSpec((None, D, tl), lambda bi, li: (bi, 0, li)),
        compiler_params=pltpu.CompilerParams(
            dimension_semantics=("parallel", "parallel"),
            vmem_limit_bytes=limit),
    )(x3, mult)

    out = (out[..., :L] if lp != L else out).reshape(shape)
    if not transposed:
        out = jnp.moveaxis(out, 1, -1)               # 'b d ... -> b ... d'
    return out


# ---------------------------------------------------------------------------
# demo / self-check
# ---------------------------------------------------------------------------

if __name__ == "__main__":
    import numpy as np

    root = jax.random.PRNGKey(0)
    B, d_model, d_state, L = 2, 32, 64, 48           # L=48 exercises the 128-pad path
    H, N2 = d_model, d_state // 2
    ks = jax.random.split(root, 8)
    dt_min, dt_max = 1e-3, 1e-1
    params = dict(
        log_dt=jax.random.uniform(ks[0], (H,)) * (math.log(dt_max) - math.log(dt_min))
               + math.log(dt_min),
        C_re=jax.random.normal(ks[1], (H, N2)) * math.sqrt(0.5),
        C_im=jax.random.normal(ks[2], (H, N2)) * math.sqrt(0.5),
        log_A_real=jnp.log(0.5 * jnp.ones((H, N2), jnp.float32)),
        A_imag=math.pi * jnp.tile(jnp.arange(N2, dtype=jnp.float32), (H, 1)),
        D=jax.random.normal(ks[3], (H,)),
        W_out=jax.random.normal(ks[4], (2 * H, H, 1)) / math.sqrt(H),
        b_out=0.1 * jax.random.normal(ks[5], (2 * H,)),
    )
    u = jax.random.normal(ks[6], (B, H, L), dtype=jnp.float32)

    # Tolerance explicitly covers: bf16 MXU weight/activation cast (vs f32-HIGHEST ref),
    # the A&S erf polynomial + approx reciprocal, and the tanh-form sigmoid.
    tol = dict(rtol=2e-2, atol=2e-2)

    # 1) module default: dropout = 0.0 (Identity) -> dropout-off kernel variant
    out_pl = jax.block_until_ready(s4d_forward(u, params))
    out_ref = s4d_forward(u, params, use_pallas=False)
    assert out_pl.shape == (B, H, L) and out_pl.dtype == u.dtype
    np.testing.assert_allclose(np.asarray(out_pl), np.asarray(out_ref), **tol)

    # 2) DropoutNd active (training, p=0.25); same tied mask key feeds both paths.
    dk = jax.random.PRNGKey(7)
    out_pl_d = jax.block_until_ready(
        s4d_forward(u, params, dropout_p=0.25, training=True, dropout_key=dk))
    out_ref_d = s4d_forward(u, params, dropout_p=0.25, training=True, dropout_key=dk,
                            use_pallas=False)
    np.testing.assert_allclose(np.asarray(out_pl_d), np.asarray(out_ref_d), **tol)

    # 3) standalone DropoutNd kernel: mask tied across spatial dims, 1/(1-p) scaling,
    #    eval-mode identity.
    x = jax.random.normal(ks[7], (2, 8, 16, 16), dtype=jnp.float32)
    p = 0.5
    yd = jax.block_until_ready(dropout_nd(x, p=p, training=True, key=jax.random.PRNGKey(3)))
    xn, yn = np.asarray(x), np.asarray(yd)
    for bb in range(xn.shape[0]):
        for dd in range(xn.shape[1]):
            sl = yn[bb, dd]
            assert (np.allclose(sl, 0.0)
                    or np.allclose(sl, xn[bb, dd] / (1.0 - p), rtol=1e-5, atol=1e-5)), \
                "dropout mask not tied / wrong scaling"
    assert np.array_equal(np.asarray(dropout_nd(x, p=p, training=False)), xn)

    print("KERNEL_OK")
</pallas_src>

<mosaic_0001>
module attributes {stable_mosaic.version = 11 : i64} {
  func.func @_s4d_post_kernel(%arg0: i32, %arg1: i32, %arg2: memref<1x32x128xf32, #tpu.memory_space<vmem>>, %arg3: memref<1x32x128xf32, #tpu.memory_space<vmem>>, %arg4: memref<32x1xf32, #tpu.memory_space<vmem>>, %arg5: memref<64x32xbf16, #tpu.memory_space<vmem>>, %arg6: memref<64x1xf32, #tpu.memory_space<vmem>>, %arg7: memref<1x32x128xf32, #tpu.memory_space<vmem>>) attributes {dimension_semantics = [#tpu.dimension_semantics<parallel>, #tpu.dimension_semantics<parallel>], iteration_bounds = array<i64: 2, 1>, scalar_prefetch = 0 : i64, scratch_operands = 0 : i64, tpu.core_type = #tpu.core_type<tc>, window_params = [{transform_indices = @transform_0, window_bounds = array<i64: 1, 32, 128>}, {transform_indices = @transform_1, window_bounds = array<i64: 1, 32, 128>}, {pipeline_mode = #tpu.pipeline_mode<synchronous>, transform_indices = @transform_2, window_bounds = array<i64: 32, 1>}, {pipeline_mode = #tpu.pipeline_mode<synchronous>, transform_indices = @transform_3, window_bounds = array<i64: 64, 32>}, {pipeline_mode = #tpu.pipeline_mode<synchronous>, transform_indices = @transform_4, window_bounds = array<i64: 64, 1>}, {transform_indices = @transform_5, window_bounds = array<i64: 1, 32, 128>}]} {
    %c0 = arith.constant 0 : index
    %c0_0 = arith.constant 0 : index
    %c0_1 = arith.constant 0 : index
    %0 = vector.load %arg2[%c0, %c0_0, %c0_1] : memref<1x32x128xf32, #tpu.memory_space<vmem>>, vector<1x32x128xf32>
    %1 = vector.shape_cast %0 : vector<1x32x128xf32> to vector<32x128xf32>
    %c0_2 = arith.constant 0 : index
    %c0_3 = arith.constant 0 : index
    %c0_4 = arith.constant 0 : index
    %2 = vector.load %arg3[%c0_2, %c0_3, %c0_4] : memref<1x32x128xf32, #tpu.memory_space<vmem>>, vector<1x32x128xf32>
    %3 = vector.shape_cast %2 : vector<1x32x128xf32> to vector<32x128xf32>
    %c0_5 = arith.constant 0 : index
    %c0_6 = arith.constant 0 : index
    %4 = vector.load %arg4[%c0_5, %c0_6] : memref<32x1xf32, #tpu.memory_space<vmem>>, vector<32x1xf32>
    %5 = vector.broadcast %4 : vector<32x1xf32> to vector<32x128xf32>
    %6 = arith.mulf %3, %5 : vector<32x128xf32>
    %7 = arith.addf %1, %6 : vector<32x128xf32>
    %c0_7 = arith.constant 0 : index
    %c0_8 = arith.constant 0 : index
    %8 = vector.load %arg5[%c0_7, %c0_8] : memref<64x32xbf16, #tpu.memory_space<vmem>>, vector<64x32xbf16>
    %c0_9 = arith.constant 0 : index
    %c0_10 = arith.constant 0 : index
    %9 = vector.load %arg6[%c0_9, %c0_10] : memref<64x1xf32, #tpu.memory_space<vmem>>, vector<64x1xf32>
    %cst = arith.constant 5.000000e-01 : f32
    %10 = vector.broadcast %cst : f32 to vector<32x128xf32>
    %11 = arith.mulf %10, %7 : vector<32x128xf32>
    %cst_11 = arith.constant 0.707106769 : f32
    %12 = vector.broadcast %cst_11 : f32 to vector<32x128xf32>
    %13 = arith.mulf %7, %12 : vector<32x128xf32>
    %14 = math.absf %13 : vector<32x128xf32>
    %cst_12 = arith.constant 0.327591091 : f32
    %15 = vector.broadcast %cst_12 : f32 to vector<32x128xf32>
    %16 = arith.mulf %15, %14 : vector<32x128xf32>
    %cst_13 = arith.constant 1.000000e+00 : f32
    %17 = vector.broadcast %cst_13 : f32 to vector<32x128xf32>
    %18 = arith.addf %17, %16 : vector<32x128xf32>
    %19 = tpu.reciprocal %18 {approx = true} : vector<32x128xf32> -> vector<32x128xf32>
    %cst_14 = arith.constant 1.06140542 : f32
    %20 = vector.broadcast %cst_14 : f32 to vector<32x128xf32>
    %21 = arith.mulf %20, %19 : vector<32x128xf32>
    %cst_15 = arith.constant -1.45315206 : f32
    %22 = vector.broadcast %cst_15 : f32 to vector<32x128xf32>
    %23 = arith.addf %21, %22 : vector<32x128xf32>
    %24 = arith.mulf %23, %19 : vector<32x128xf32>
    %cst_16 = arith.constant 1.42141378 : f32
    %25 = vector.broadcast %cst_16 : f32 to vector<32x128xf32>
    %26 = arith.addf %24, %25 : vector<32x128xf32>
    %27 = arith.mulf %26, %19 : vector<32x128xf32>
    %cst_17 = arith.constant -0.284496725 : f32
    %28 = vector.broadcast %cst_17 : f32 to vector<32x128xf32>
    %29 = arith.addf %27, %28 : vector<32x128xf32>
    %30 = arith.mulf %29, %19 : vector<32x128xf32>
    %cst_18 = arith.constant 0.254829586 : f32
    %31 = vector.broadcast %cst_18 : f32 to vector<32x128xf32>
    %32 = arith.addf %30, %31 : vector<32x128xf32>
    %33 = arith.mulf %32, %19 : vector<32x128xf32>
    %cst_19 = arith.constant 0.000000e+00 : f32
    %34 = vector.broadcast %cst_19 : f32 to vector<32x128xf32>
    %35 = arith.subf %34, %14 : vector<32x128xf32>
    %36 = arith.mulf %35, %14 : vector<32x128xf32>
    %37 = math.exp %36 : vector<32x128xf32>
    %38 = arith.mulf %33, %37 : vector<32x128xf32>
    %cst_20 = arith.constant 1.000000e+00 : f32
    %39 = vector.broadcast %cst_20 : f32 to vector<32x128xf32>
    %40 = arith.subf %39, %38 : vector<32x128xf32>
    %cst_21 = arith.constant 0.000000e+00 : f32
    %41 = vector.broadcast %cst_21 : f32 to vector<32x128xf32>
    %42 = arith.cmpf oge, %13, %41 : vector<32x128xf32>
    %cst_22 = arith.constant 0.000000e+00 : f32
    %43 = vector.broadcast %cst_22 : f32 to vector<32x128xf32>
    %44 = arith.subf %43, %40 : vector<32x128xf32>
    %45 = arith.select %42, %40, %44 : vector<32x128xi1>, vector<32x128xf32>
    %cst_23 = arith.constant 1.000000e+00 : f32
    %46 = vector.broadcast %cst_23 : f32 to vector<32x128xf32>
    %47 = arith.addf %46, %45 : vector<32x128xf32>
    %48 = arith.mulf %11, %47 : vector<32x128xf32>
    %49 = arith.truncf %48 : vector<32x128xf32> to vector<32x128xbf16>
    %cst_24 = arith.constant dense<0.000000e+00> : vector<64x128xf32>
    %50 = tpu.matmul %8, %49, %cst_24 {dimension_numbers = #tpu.dot_dimension_numbers<[1], [0], [0], [1], [0, 0, 1, 1], [], []>} : vector<64x32xbf16>, vector<32x128xbf16>, vector<64x128xf32> -> vector<64x128xf32>
    %51 = vector.broadcast %9 : vector<64x1xf32> to vector<64x128xf32>
    %52 = arith.addf %50, %51 : vector<64x128xf32>
    %53 = vector.extract_strided_slice %52 {offsets = [32, 0], sizes = [32, 128], strides = [1, 1]} : vector<64x128xf32> to vector<32x128xf32>
    %cst_25 = arith.constant 5.000000e-01 : f32
    %54 = vector.broadcast %cst_25 : f32 to vector<32x128xf32>
    %55 = arith.mulf %54, %53 : vector<32x128xf32>
    %56 = math.tanh %55 : vector<32x128xf32>
    %cst_26 = arith.constant 1.000000e+00 : f32
    %57 = vector.broadcast %cst_26 : f32 to vector<32x128xf32>
    %58 = arith.addf %56, %57 : vector<32x128xf32>
    %cst_27 = arith.constant 5.000000e-01 : f32
    %59 = vector.broadcast %cst_27 : f32 to vector<32x128xf32>
    %60 = arith.mulf %59, %58 : vector<32x128xf32>
    %61 = vector.extract_strided_slice %52 {offsets = [0, 0], sizes = [32, 128], strides = [1, 1]} : vector<64x128xf32> to vector<32x128xf32>
    %62 = arith.mulf %61, %60 : vector<32x128xf32>
    %c0_28 = arith.constant 0 : index
    %c0_29 = arith.constant 0 : index
    %c0_30 = arith.constant 0 : index
    %63 = vector.load %arg7[%c0_28, %c0_29, %c0_30] : memref<1x32x128xf32, #tpu.memory_space<vmem>>, vector<1x32x128xf32>
    %64 = vector.shape_cast %63 : vector<1x32x128xf32> to vector<32x128xf32>
    %65 = vector.shape_cast %62 : vector<32x128xf32> to vector<1x32x128xf32>
    tpu.vector_store %arg7[%c0_28, %c0_29, %c0_30], %65 {strides = array<i32>} : memref<1x32x128xf32, #tpu.memory_space<vmem>>, vector<1x32x128xf32>,
    return
  }
  func.func @transform_0(%arg0: i32, %arg1: i32) -> (i32, i32, i32) {
    %c0_i32 = arith.constant 0 : i32
    %c0_i32_0 = arith.constant 0 : i32
    return %arg0, %c0_i32, %arg1 : i32, i32, i32
  }
  func.func @transform_1(%arg0: i32, %arg1: i32) -> (i32, i32, i32) {
    %c0_i32 = arith.constant 0 : i32
    %c0_i32_0 = arith.constant 0 : i32
    return %arg0, %c0_i32, %arg1 : i32, i32, i32
  }
  func.func @transform_2(%arg0: i32, %arg1: i32) -> (i32, i32) {
    %c0_i32 = arith.constant 0 : i32
    %c0_i32_0 = arith.constant 0 : i32
    %c0_i32_1 = arith.constant 0 : i32
    return %c0_i32, %c0_i32_0 : i32, i32
  }
  func.func @transform_3(%arg0: i32, %arg1: i32) -> (i32, i32) {
    %c0_i32 = arith.constant 0 : i32
    %c0_i32_0 = arith.constant 0 : i32
    %c0_i32_1 = arith.constant 0 : i32
    return %c0_i32, %c0_i32_0 : i32, i32
  }
  func.func @transform_4(%arg0: i32, %arg1: i32) -> (i32, i32) {
    %c0_i32 = arith.constant 0 : i32
    %c0_i32_0 = arith.constant 0 : i32
    %c0_i32_1 = arith.constant 0 : i32
    return %c0_i32, %c0_i32_0 : i32, i32
  }
  func.func @transform_5(%arg0: i32, %arg1: i32) -> (i32, i32, i32) {
    %c0_i32 = arith.constant 0 : i32
    %c0_i32_0 = arith.constant 0 : i32
    return %arg0, %c0_i32, %arg1 : i32, i32, i32
  }
}

</mosaic_0001>

<bundles_post_ra>
// kernel: tpu_custom_call.1
= control target key start
LH: loop header
LB: loop body
LE: loop exit
PB: predicated region body
PF: predicated region fallthrough
CT: control target
= control target key end

     0   :  { %10 = vsyncpa [#allocation3], 0  ;;  %s1171_s0 = inlined_call_operand.vmem [shape: f32[2,32,128], index: 0, kind: input, shape index: {}]   ;;  %s1172_s1 = inlined_call_operand.vmem [shape: f32[2,32,128], index: 1, kind: input, shape index: {}]   ;;  %s1173_s2 = inlined_call_operand.vmem [shape: f32[32,1], index: 2, kind: input, shape index: {}]   ;;  %s1174_s3 = inlined_call_operand.vmem [shape: bf16[64,32], index: 3, kind: input, shape index: {}]   ;;  %s1175_s4 = inlined_call_operand.vmem [shape: f32[64,1], index: 4, kind: input, shape index: {}]   ;;  %s1176_s5 = inlined_call_operand.hbm [shape: f32[2,32,128], index: 5, kind: output, shape index: {}]  }
   0x1   :  { %12 = vsyncpa [#allocation3 + $0x1], 0  ;;  %s965_s18 = smov 0   ;;  %s967_s19 = smov 0  }
   0x2   :  { %s969_s20 = smov 0   ;;  %s971_s21 = smov 0  }
   0x3   :  { %s973_s22 = smov 0   ;;  %s975_s23 = smov 0  }
   0x4 LB: > { %s715_s24 = sadd.s32 4294967295, %s929_s23   ;;  %s716_s25 = sadd.s32 4294967294, %s929_s23   ;;  %s929_s23 = sphi %s975_s23, %s18_s23   ;;  %s925_s22 = sphi %s973_s22, %s1183_s22   ;;  %s921_s21 = sphi %s971_s21, %s1182_s21   ;;  %s917_s20 = sphi %s969_s20, %s1181_s20   ;;  %s913_s19 = sphi %s967_s19, %s1180_s19   ;;  %s909_s18 = sphi %s965_s18, %s1179_s18  }
   0x5   : > { %s30_s26 = sadd.s32 1, %s925_s22  ;;  %s158_s27 = sadd.s32 1, %s917_s20 }
   0x6   : > { %p32_p0 = scmp.ge.s32.totalorder %s30_s26, 2  ;;  %p168_p1 = scmp.ne.s32.totalorder %s917_s20, %s913_s19 }
   0x7   : > { %p169_p2 = scmp.eq.s32.totalorder %s715_s24, 1  ;;  %p174_p3 = scmp.ne.s32.totalorder %s913_s19, %s909_s18 }
   0x8   : > { %s1185_s26 = smov (%p32_p0, %s30_s26), 0  ;;  %p175_p5 = scmp.eq.s32.totalorder %s716_s25, 1 }
   0x9   : > { %p1005_p4 = por %p169_p2, %p168_p1  ;;  %s153_s29 = ssub.s32 %s925_s22, %s1185_s26 }
   0xa   : > { %p719_p6 = scmp.ge.s32.totalorder %s929_s23, 1  ;;  %p156_p7 = scmp.eq.s32.totalorder %s153_s29, 0 }
   0xb   : > { %p1012_p8 = por %p175_p5, %p174_p3  ;;  %p224_p9 = scmp.lt.s32.totalorder %s929_s23, 3 }
   0xc   : > { %s1018_s6 = scalar_select %p156_p7, %s917_s20, %s158_s27  }
   0xd   : > { %p225_p10 = pnand %p719_p6, %p224_p9 }
   0xe   : > { %v290_v0 = vld [vmem:[%s1173_s2 + $0x10] sm:$0xff] (!%p225_p10)  ;;  %v288_v1 = vld [vmem:[%s1173_s2] sm:$0xff] (!%p225_p10)  ;;  %v931_v2 = vmov (!%p225_p10), 0   ;;  %v291_v3 = vld [vmem:[%s1173_s2 + $0x18] sm:$0xff] (!%p225_p10)  ;;  %vm502_vm0 = vcmask (!%p225_p10), 261120   ;;  %p263_p11 = scmp.lt.s32.totalorder (!%p225_p10), %s921_s21, 1 }
   0xf   : > { %228 = sbr.rel (%p225_p10) target bundleno = 462 (0x1ce), region = 40  ;;  %822 = vset.pattern.permute.xlu1 (!%p225_p10), %v931_v2  ;;  %821 = vset.pattern.permute.xlu0 (!%p225_p10), %v931_v2  ;;  %v289_v4 = vld [vmem:[%s1173_s2 + $0x8] sm:$0xff] (!%p225_p10)  ;;  %v332_v6 = vld [vmem:[%s1175_s4 + $0x20] sm:$0xff] (!%p225_p10)  ;;  %v335_v7 = vld [vmem:[%s1175_s4 + $0x38] sm:$0xff] (!%p225_p10)  ;;  %s260_s17 = sand.u32 (!%p225_p10), 1, %s913_s19  }
  0x10   : > { %304 = vperm.xlu1 (!%p225_p10), %822, %v290_v0   ;;  %294 = vperm.xlu0 (!%p225_p10), %821, %v288_v1   ;;  %v333_v5 = vld [vmem:[%s1175_s4 + $0x28] sm:$0xff] (!%p225_p10)  ;;  %v334_v8 = vld [vmem:[%s1175_s4 + $0x30] sm:$0xff] (!%p225_p10)  ;;  %v328_v10 = vld [vmem:[%s1175_s4] sm:$0xff] (!%p225_p10)  ;;  %s720_s24 = sshll.u32 (!%p225_p10), %s260_s17, 5  ;;  %s740_s25 = sshll.u32 (!%p225_p10), %s921_s21, 9 }
  0x11   : > { %v329_v9 = vld [vmem:[%s1175_s4 + $0x8] sm:$0xff] (!%p225_p10)  ;;  %v331_v11 = vld [vmem:[%s1175_s4 + $0x18] sm:$0xff] (!%p225_p10)  ;;  %v330_v12 = vld [vmem:[%s1175_s4 + $0x10] sm:$0xff] (!%p225_p10)  ;;  %s932_s11 = smov (!%p225_p10), [#allocation2]  }
  0x12   : > { %v823_v13 = vld [vmem:[%s1174_s3] sm:$0xff] (!%p225_p10)   ;;  %v824_v14 = vld [vmem:[%s1174_s3 + $0x10] sm:$0xff] (!%p225_p10)  }
  0x13   : > { %751 = vmatprep.mubr.msk.bf16.mxu0 (!%p225_p10), %vm502_vm0, %v823_v13  ;;  %755 = vmatprep.mubr.msk.bf16.mxu1 (!%p225_p10), %vm502_vm0, %v824_v14 }
  0x14   : > { %309 = vperm.xlu1 (!%p225_p10), %822, %v291_v3   ;;  %299 = vperm.xlu0 (!%p225_p10), %821, %v289_v4  }
  0x16   : > { %s264_s27 = scalar_select %p263_p11, %s921_s21, 1 }
  0x17   : > { %s1125_s21 = scalar_lea.sflag [#allocation3], %s260_s17 }
  0x18   : > { %469 = vperm.xlu1 %822, %v333_v5   ;;  %464 = vperm.xlu0 %821, %v332_v6   ;;  %s738_s29 = sshll.u32 %s264_s27, 5  ;;  %s262_s27 = scalar_lea.vmem [#allocation2], %s720_s24 }
  0x19   : > { %s278_s9 = scalar_lea.vmem %s1172_s1, %s738_s29  ;;  %s270_s12 = scalar_lea.vmem %s1171_s0, %s738_s29 }
  0x1a   : > { %v286_v15 = vld [vmem:[%s278_s9 + $0x10] sm:$0xff]  ;;  %v284_v16 = vld [vmem:[%s278_s9] sm:$0xff]  ;;  %v287_v25 = vld [vmem:[%s278_s9 + $0x18] sm:$0xff]  ;;  %s619_s29 = sshll.u32 %s262_s27, 4  ;;  %s1121_s29 = int_to_ptr.vmem [resolvable:$true] %s619_s29 }
  0x1b   : > { %v282_v18 = vld [vmem:[%s270_s12 + $0x10] sm:$0xff]  ;;  %v280_v20 = vld [vmem:[%s270_s12] sm:$0xff]  ;;  %v285_v26 = vld [vmem:[%s278_s9 + $0x8] sm:$0xff]  ;;  %s1119_s9 = scalar_lea.hbm %s1176_s5, %s740_s25  ;;  %s851_s10 = scalar_lea.vmem %s1121_s29, 512 }
  0x1c   : > { %479 = vperm.xlu1 %822, %v335_v7   ;;  %474 = vperm.xlu0 %821, %v334_v8   ;;  %v283_v31 = vld [vmem:[%s270_s12 + $0x18] sm:$0xff]  ;;  %v281_v32 = vld [vmem:[%s270_s12 + $0x8] sm:$0xff]  ;;  %p852_p12 = scmp.ne.s32.totalorder %s1121_s29, %s851_s10  ;;  %s855_s12 = sshll.u32 %s932_s11, 4  ;;  %s856_s12 = int_to_ptr.vmem [resolvable:$false] %s855_s12 }
  0x1d   : > { %s857_s13 = scalar_lea.vmem %s856_s12, 1024  ;;  %p858_p1 = scmp.lt.s32.totalorder %s1121_s29, %s856_s12 }
  0x1e   : > { %p853_p13 = pnand %p852_p12, %p1005_p4  ;;  %p859_p2 = scmp.lt.s32.totalorder %s857_s13, %s851_s10 }
  0x20   : > { %449 = vperm.xlu1 %822, %v329_v9   ;;  %444 = vperm.xlu0 %821, %v328_v10   ;;  %p854_p0 = pneg %p853_p13  ;;  %p860_p3 = por %p859_p2, %p858_p1 }
  0x22   : > { %p861_p5 = pnand %p860_p3, %p854_p0 }
  0x24   : > { %459 = vperm.xlu1 %822, %v331_v11   ;;  %454 = vperm.xlu0 %821, %v330_v12  }
  0x8f   : > { %v305_v17 = vpop.permute.xlu1 %304  ;;  %v295_v19 = vpop.permute.xlu0 %294 }
  0x90   : > { %v314_v21 = vmul.f32 %v305_v17, %v286_v15  ;;  %v312_v22 = vmul.f32 %v295_v19, %v284_v16 }
  0x92   : > { %v1072_v23 = vadd.f32 %v314_v21, %v282_v18  ;;  %v1074_v24 = vadd.f32 %v312_v22, %v280_v20 }
  0x93   : > { %v310_v27 = vpop.permute.xlu1 %309  ;;  %v300_v28 = vpop.permute.xlu0 %299 }
  0x94   : > { %v1077_v29 = vmul.f32 0.70710677, %v1072_v23  ;;  %v1080_v30 = vmul.f32 0.70710677, %v1074_v24  ;;  %v315_v33 = vmul.f32 %v310_v27, %v287_v25  ;;  %v313_v34 = vmul.f32 %v300_v28, %v285_v26 }
  0x96   : > { %v346_v35 = vand.u32 2147483647, %v1077_v29  ;;  %v344_v36 = vand.u32 2147483647, %v1080_v30  ;;  %v1084_v37 = vadd.f32 %v315_v33, %v283_v31  ;;  %v1086_v38 = vadd.f32 %v313_v34, %v281_v32 }
  0x97   : > { %vm420_vm1 = vcmp.ge.f32.partialorder %v1080_v30, 0.0  ;;  %vm422_vm2 = vcmp.ge.f32.partialorder %v1077_v29, 0.0  ;;  %v338_v29 = vmul.f32 0.5, %v1072_v23  ;;  %v826_v23 = vld [vmem:[%s1174_s3 + $0x18] sm:$0xff]  }
  0x98   : > { %v350_v39 = vmul.f32 0.3275911, %v346_v35  ;;  %v348_v40 = vmul.f32 0.3275911, %v344_v36  ;;  %v1089_v41 = vmul.f32 0.70710677, %v1084_v37 }
  0x99   : > { %v1092_v42 = vmul.f32 0.70710677, %v1086_v38  ;;  %v398_v51 = vsub.f32 0.0, %v346_v35  ;;  %v396_v52 = vsub.f32 0.0, %v344_v36  ;;  %v339_v30 = vmul.f32 0.5, %v1084_v37  ;;  %v470_v37 = vpop.permute.xlu1 %469 }
  0x9a   : > { %v354_v43 = vadd.f32 1.0, %v350_v39  ;;  %v352_v44 = vadd.f32 1.0, %v348_v40  ;;  %v347_v45 = vand.u32 2147483647, %v1089_v41  ;;  %vm423_vm3 = vcmp.ge.f32.partialorder %v1089_v41, 0.0 }
  0x9b   : > { %v345_v46 = vand.u32 2147483647, %v1092_v42  ;;  %v402_v54 = vmul.f32 %v398_v51, %v346_v35  ;;  %v400_v57 = vmul.f32 %v396_v52, %v344_v36  ;;  %vm421_vm4 = vcmp.ge.f32.partialorder %v1092_v42, 0.0 }
  0x9c   : > { %827 = vrcp.f32 %v354_v43  ;;  %v351_v47 = vmul.f32 0.3275911, %v347_v45  ;;  %v399_v58 = vsub.f32 0.0, %v347_v45 }
  0x9d   : > { %829 = vrcp.f32 %v352_v44  ;;  %v349_v48 = vmul.f32 0.3275911, %v345_v46  ;;  %v397_v60 = vsub.f32 0.0, %v345_v46  ;;  %v408_v62 = vmul.f32 1.442695, %v402_v54 }
  0x9e   : > { %v355_v49 = vadd.f32 1.0, %v351_v47  ;;  %v404_v2 = vmul.f32 1.442695, %v400_v57  ;;  %v403_v3 = vmul.f32 %v399_v58, %v347_v45 }
  0x9f   : > { %v353_v50 = vadd.f32 1.0, %v349_v48  ;;  %v401_v7 = vmul.f32 %v397_v60, %v345_v46 }
  0xa0   : > { %831 = vrcp.f32 %v355_v49  ;;  %v410_v13 = vmul.f32 1.442695, %v403_v3  ;;  %v336_v3 = vmul.f32 0.5, %v1074_v24  ;;  %v825_v24 = vld [vmem:[%s1174_s3 + $0x8] sm:$0xff]  }
  0xa1   : > { %833 = vrcp.f32 %v353_v50  ;;  %v406_v17 = vmul.f32 1.442695, %v401_v7  ;;  %v337_v7 = vmul.f32 0.5, %v1086_v38  ;;  %v465_v38 = vpop.permute.xlu0 %464 }
  0xa2   : > { %835 = vpow2.f32 %v408_v62 }
  0xa3   : > { %837 = vpow2.f32 %v404_v2 }
  0xa4   : > { %839 = vpow2.f32 %v410_v13  ;;  %v480_v13 = vpop.permute.xlu1 %479 }
  0xa5   : > { %841 = vpow2.f32 %v406_v17 }
  0xa6   : > { %v828_v53 = vpop.eup %827 }
  0xa7   : > { %v830_v55 = vpop.eup %829  ;;  %v362_v56 = vmul.f32 1.0614054, %v828_v53 }
  0xa8   : > { %v360_v59 = vmul.f32 1.0614054, %v830_v55 }
  0xa9   : > { %v366_v61 = vadd.f32 -1.4531521, %v362_v56 }
  0xaa   : > { %v364_v63 = vadd.f32 -1.4531521, %v360_v59  ;;  %v832_v0 = vpop.eup %831 }
  0xab   : > { %v370_v1 = vmul.f32 %v828_v53, %v366_v61  ;;  %v834_v4 = vpop.eup %833  ;;  %v363_v6 = vmul.f32 1.0614054, %v832_v0 }
  0xac   : > { %v368_v5 = vmul.f32 %v830_v55, %v364_v63  ;;  %v361_v9 = vmul.f32 1.0614054, %v834_v4  ;;  %v836_v36 = vpop.eup %835 }
  0xad   : > { %v374_v8 = vadd.f32 1.4214138, %v370_v1  ;;  %v367_v11 = vadd.f32 -1.4531521, %v363_v6  ;;  %v838_v43 = vpop.eup %837 }
  0xae   : > { %v372_v10 = vadd.f32 1.4214138, %v368_v5  ;;  %v365_v14 = vadd.f32 -1.4531521, %v361_v9  ;;  %v840_v52 = vpop.eup %839 }
  0xaf   : > { %v378_v12 = vmul.f32 %v828_v53, %v374_v8  ;;  %v371_v16 = vmul.f32 %v832_v0, %v367_v11  ;;  %v842_v56 = vpop.eup %841 }
  0xb0   : > { %v376_v15 = vmul.f32 %v830_v55, %v372_v10  ;;  %v369_v19 = vmul.f32 %v834_v4, %v365_v14  ;;  %v475_v14 = vpop.permute.xlu0 %474 }
  0xb1   : > { %v382_v18 = vadd.f32 -0.28449672, %v378_v12  ;;  %v375_v21 = vadd.f32 1.4214138, %v371_v16 }
  0xb2   : > { %v380_v20 = vadd.f32 -0.28449672, %v376_v15  ;;  %v373_v25 = vadd.f32 1.4214138, %v369_v19 }
  0xb3   : > { %v386_v22 = vmul.f32 %v828_v53, %v382_v18  ;;  %v379_v27 = vmul.f32 %v832_v0, %v375_v21 }
  0xb4   : > { %v384_v26 = vmul.f32 %v830_v55, %v380_v20  ;;  %v377_v31 = vmul.f32 %v834_v4, %v373_v25 }
  0xb5   : > { %v390_v28 = vadd.f32 0.2548296, %v386_v22  ;;  %v383_v33 = vadd.f32 -0.28449672, %v379_v27 }
  0xb6   : > { %v388_v32 = vadd.f32 0.2548296, %v384_v26  ;;  %v381_v35 = vadd.f32 -0.28449672, %v377_v31 }
  0xb7   : > { %v394_v34 = vmul.f32 %v828_v53, %v390_v28  ;;  %v387_v40 = vmul.f32 %v832_v0, %v383_v33 }
  0xb8   : > { %v392_v39 = vmul.f32 %v830_v55, %v388_v32  ;;  %v385_v45 = vmul.f32 %v834_v4, %v381_v35  ;;  %v445_v35 = vpop.permute.xlu0 %444 }
  0xb9   : > { %v414_v44 = vmul.f32 %v836_v36, %v394_v34  ;;  %v391_v47 = vadd.f32 0.2548296, %v387_v40  ;;  %v450_v36 = vpop.permute.xlu1 %449 }
  0xba   : > { %v412_v46 = vmul.f32 %v838_v43, %v392_v39  ;;  %v389_v49 = vadd.f32 0.2548296, %v385_v45 }
  0xbb   : > { %v418_v48 = vsub.f32 1.0, %v414_v44  ;;  %v395_v51 = vmul.f32 %v832_v0, %v391_v47 }
  0xbc   : > { %v416_v50 = vsub.f32 1.0, %v412_v46  ;;  %v393_v54 = vmul.f32 %v834_v4, %v389_v49  ;;  %v455_v45 = vpop.permute.xlu0 %454 }
  0xbd   : > { %v415_v58 = vmul.f32 %v840_v52, %v395_v51  ;;  %v426_v59 = vsub.f32 0.0, %v418_v48  ;;  %v460_v51 = vpop.permute.xlu1 %459 }
  0xbe   : > { %v424_v57 = vsub.f32 0.0, %v416_v50  ;;  %v413_v53 = vmul.f32 %v842_v56, %v393_v54 }
  0xbf   : > { %v419_v55 = vsub.f32 1.0, %v415_v58  ;;  %v430_v63 = vsel %vm422_vm2, %v418_v48, %v426_v59 }
  0xc0   : > { %v428_v60 = vsel %vm420_vm1, %v416_v50, %v424_v57  ;;  %v417_v61 = vsub.f32 1.0, %v413_v53  ;;  %v434_v6 = vadd.f32 1.0, %v430_v63 }
  0xc1   : > { %v427_v62 = vsub.f32 0.0, %v419_v55  ;;  %v432_v0 = vadd.f32 1.0, %v428_v60 }
  0xc2   : > { %v425_v1 = vsub.f32 0.0, %v417_v61  ;;  %v438_v11 = vmul.f32 %v434_v6, %v338_v29 }
  0xc3   : > { %v431_v2 = vsel %vm423_vm3, %v419_v55, %v427_v62  ;;  %v436_v9 = vmul.f32 %v432_v0, %v336_v3 }
  0xc4   : > { %v435_v4 = vadd.f32 1.0, %v431_v2  ;;  %v429_v5 = vsel %vm421_vm4, %v417_v61, %v425_v1 }
  0xc5   : > { %v433_v8 = vadd.f32 1.0, %v429_v5 }
  0xc6   : > { %v439_v10 = vmul.f32 %v435_v4, %v339_v30 }
  0xc7   : > { %v437_v41 = vmul.f32 %v433_v8, %v337_v7 }
  0xc8   : > { %v441_v42 = vpack.c.bf16 %v439_v10, %v438_v11 }
  0xc9   : > { %v440_v12 = vpack.c.bf16 %v437_v41, %v436_v9 }
  0xcb   : > { %747 = vmatprep.subr.bf16.mxu0 %v440_v12  ;;  %759 = vmatprep.subr.bf16.mxu1 %v440_v12 }
  0xcc   : > { %748 = vmatpush3.bf16.msra.mxu0 %v440_v12  ;;  %761 = vmatpush3.bf16.msra.mxu1 %v440_v12 }
  0xcd   : > { %749 = vmatprep.subr.bf16.mxu0 %v441_v42  ;;  %760 = vmatprep.subr.bf16.mxu1 %v441_v42 }
  0xd0   : > { %750 = vmatpush3.bf16.msra.mxu0 %v441_v42  ;;  %762 = vmatpush3.bf16.msra.mxu1 %v441_v42 }
  0xd3   : > { %752 = vmatmul.mubr.msk.bf16.vlgmr.msra.gmra.mrb[0].mxu0 %vm502_vm0, %v825_v24  ;;  %756 = vmatmul.mubr.msk.bf16.vlgmr.msra.gmra.mrb[0].mxu1 %vm502_vm0, %v826_v23 }
 0x1a6   : > { %v753_v15 = vpop.f32.mrb[0].mxu0  ;;  %v757_v16 = vpop.f32.mrb[0].mxu1 }
 0x1a7   : > { %v574_v17 = vadd.f32 %v757_v16, %v475_v14  ;;  %v549_v18 = vpop.f32.mrb[1].mxu0  ;;  %v565_v19 = vpop.f32.mrb[1].mxu1  ;;  %v558_v48 = vadd.f32 %v753_v15, %v455_v45 }
 0x1a8   : > { %v566_v20 = vadd.f32 %v565_v19, %v465_v38  ;;  %v754_v21 = vpop.f32.mrb[2].mxu0  ;;  %v758_v22 = vpop.f32.mrb[2].mxu1  ;;  %v550_v52 = vadd.f32 %v549_v18, %v445_v35 }
 0x1a9   : > { %v582_v25 = vmul.f32 0.5, %v574_v17  ;;  %v577_v26 = vadd.f32 %v758_v22, %v480_v13  ;;  %v552_v27 = vpop.f32.mrb[3].mxu0  ;;  %v568_v28 = vpop.f32.mrb[3].mxu1  ;;  %v561_v58 = vadd.f32 %v754_v21, %v460_v51 }
 0x1aa   : > { %v580_v31 = vmul.f32 0.5, %v566_v20  ;;  %v569_v32 = vadd.f32 %v568_v28, %v470_v37  ;;  %v553_v55 = vadd.f32 %v552_v27, %v450_v36 }
 0x1ab   : > { %843 = vtanh.f32 %v582_v25  ;;  %v583_v33 = vmul.f32 0.5, %v577_v26 }
 0x1ac   : > { %845 = vtanh.f32 %v580_v31  ;;  %v581_v34 = vmul.f32 0.5, %v569_v32 }
 0x1ad   : > { %847 = vtanh.f32 %v583_v33 }
 0x1ae   : > { %849 = vtanh.f32 %v581_v34 }
 0x1b5   : > { %v844_v39 = vpop.eup %843 }
 0x1b6   : > { %v846_v40 = vpop.eup %845  ;;  %v590_v43 = vadd.f32 1.0, %v844_v39 }
 0x1b7   : > { %v848_v44 = vpop.eup %847  ;;  %v588_v46 = vadd.f32 1.0, %v846_v40 }
 0x1b8   : > { %v850_v47 = vpop.eup %849  ;;  %v594_v49 = vmul.f32 0.5, %v590_v43  ;;  %v591_v50 = vadd.f32 1.0, %v848_v44 }
 0x1b9   : > { %v592_v54 = vmul.f32 0.5, %v588_v46  ;;  %v589_v56 = vadd.f32 1.0, %v850_v47 }
 0x1ba   : > { %v598_v57 = vmul.f32 %v594_v49, %v558_v48  ;;  %v595_v59 = vmul.f32 0.5, %v591_v50 }
 0x1bb   : > { %v596_v53 = vmul.f32 %v592_v54, %v550_v52  ;;  %v593_v60 = vmul.f32 0.5, %v589_v56 }
 0x1bc   : > { %602 = vst [vmem:[%s262_s27 + $0x10] sm:$0xff] %v598_v57  ;;  %v599_v61 = vmul.f32 %v595_v59, %v561_v58 }
 0x1bd   : > { %600 = vst [vmem:[%s262_s27] sm:$0xff] %v596_v53  ;;  %v597_v62 = vmul.f32 %v593_v60, %v553_v55 }
 0x1be   : > { %603 = vst [vmem:[%s262_s27 + $0x18] sm:$0xff] %v599_v61 }
 0x1bf   : > { %601 = vst [vmem:[%s262_s27 + $0x8] sm:$0xff] %v597_v62 }
 0x1c0   : > { %864 = shalt.err (!%p861_p5)
}
 0x1c1   : > { %s865_s14 = scalar_lea.hbm %s1119_s9, 512  ;;  %s869_s17 = scalar_lea.hbm %s1176_s5, 1024 }
 0x1c2   : > { %p866_p6 = scmp.ne.s32.totalorder %s1119_s9, %s865_s14  ;;  %p870_p10 = scmp.lt.u32.totalorder %s1119_s9, %s1176_s5 }
 0x1c3   : > { %p871_p11 = scmp.lt.u32.totalorder %s869_s17, %s865_s14  ;;  %p873_p13 = scmp.lt.u32.totalorder %s865_s14, %s1119_s9 }
 0x1c4   : > { %p867_p7 = pnand %p866_p6, %p1005_p4 }
 0x1c5   : > { %p872_p12 = por %p871_p11, %p870_p10 }
 0x1c6   : > { %p868_p9 = pneg %p867_p7 }
 0x1c7   : > { %p874_p0 = por %p873_p13, %p872_p12 }
 0x1c9   : > { %p875_p1 = pnand %p874_p0, %p868_p9 }
 0x1cb   : > { %878 = shalt.err (!%p875_p1)
}
 0x1cc   : > { %s933_s27 = smov 128   ;;  %s934_s7 = smov 8  }
 0x1cd   : > { %763 = dma.vmem_to_hbm [thread:$0]  (%p1005_p4), %s1121_s29, 512, %s1119_s9, %s1125_s21, %s933_s27, %s933_s27, %s934_s7  }
 0x1ce PF: > { %p769_p2 = scmp.ge.s32.totalorder %s929_s23, 2  ;;  %s634_s8 = sand.u32 1, %s909_s18  }
 0x1cf   : > { %s635_s10 = scalar_lea.sflag [#allocation3], %s634_s8 }
 0x1d0   : > { %p766_p3 = pnand %p769_p2, %p1012_p8 }
 0x1d2   : > { %904 = dma.done.wait (!%p766_p3), %s635_s10, 512  }
 0x1d3   : > { %906 = vsyncadd (!%p766_p3), %s635_s10, 4294966784  ;;  %s18_s23 = sadd.s32 1, %s929_s23   ;;  %s1179_s18 = smov %s913_s19 }
 0x1d4   : > { %p15_p5 = scmp.ge.s32.totalorder %s18_s23, 4   ;;  %s1180_s19 = smov %s917_s20 }
 0x1d5   : > { %s1181_s20 = smov %s1018_s6  ;;  %s1182_s21 = smov %s925_s22 }
 0x1d6   : > { %s1183_s22 = smov %s1185_s26  ;;  %17 = sbr.rel (!%p15_p5) target bundleno = 4 (0x4), region = 78 }
 0x1dd   :  { %640 = vsyncpa [#allocation3], 1 }
 0x1de   :  { %642 = vsyncpa [#allocation3 + $0x1], 1 }

</bundles_post_ra>
